<compile_context>
chip_gen: v5e
topology: v5e:2x2
jax: 0.10.0
libtpu: 0.0.40
codegen_flags: <defaults>
</compile_context>

<pallas_src>
import functools
import math

import jax
import jax.numpy as jnp
from jax import lax
from jax.experimental import pallas as pl
from jax.experimental.pallas import tpu as pltpu

_MIN_SUBLANES = 8  # sublane granularity for the second-to-last block dim


def _rmsnorm_kernel(x_ref, w_ref, o_ref, *, eps):
    """One row-block grid step.

    x_ref : (Tm, D)  input rows
    w_ref : (1, D)   scale parameter (broadcast over rows)
    o_ref : (Tm, D)  output rows
    """
    xf = x_ref[...].astype(jnp.float32)                       # (Tm, D)
    # mean of squares over the feature axis (lanes), accumulated in f32
    ms = jnp.mean(xf * xf, axis=-1, keepdims=True)            # (Tm, 1)
    inv = lax.rsqrt(ms + eps)                                 # EUP rsqrt (free slot)
    wf = w_ref[...].astype(jnp.float32)                       # (1, D)
    o_ref[...] = (xf * inv * wf).astype(o_ref.dtype)


def _round_down_to(v: int, m: int) -> int:
    return (v // m) * m


def _choose_block_rows(n_rows: int, bytes_per_row: int, tile_budget_bytes: int) -> int:
    """Pick a multiple-of-8 row count that fits the byte budget while keeping
    the grid at >= ~4 steps (so both v7x TensorCores stay busy)."""
    if n_rows <= _MIN_SUBLANES:
        return n_rows  # full-extent block is always a legal block shape
    budget_rows = max(
        _MIN_SUBLANES,
        _round_down_to(tile_budget_bytes // max(1, bytes_per_row), _MIN_SUBLANES),
    )
    steps_cap = max(_MIN_SUBLANES, _round_down_to(n_rows // 4, _MIN_SUBLANES))
    return min(budget_rows, steps_cap)


def rmsnorm_forward(x, weight, eps: float = 1e-6):
    """x: (..., D); weight: (D,).  Returns same shape/dtype as x."""
    orig_shape = x.shape
    D = orig_shape[-1]
    N = max(1, math.prod(orig_shape[:-1]))

    x2 = x.reshape(N, D)
    w2 = weight.reshape(1, D)
    itemsize = x2.dtype.itemsize
    w_itemsize = w2.dtype.itemsize

    # ---- per-generation VMEM / tile budget ---------------------------------
    try:
        vmem_cap = int(pltpu.get_tpu_info().vmem_capacity_bytes)
    except Exception:
        vmem_cap = 64 << 20                      # conservative (v7x per-TC VMEM)
    # Input and output tiles are each double-buffered -> ~4x tile bytes of
    # pipeline VMEM.  Keep that well under physical capacity.
    max_pipeline_bytes = min(48 << 20, vmem_cap // 2)
    tile_budget = min(4 << 20, max_pipeline_bytes // 4)

    block_rows = _choose_block_rows(N, D * itemsize, tile_budget)
    grid = (pl.cdiv(N, block_rows),)

    tile_bytes = block_rows * D * itemsize
    vmem_limit = max(4 * tile_bytes + 2 * D * w_itemsize + (2 << 20), 16 << 20)
    vmem_limit = min(vmem_limit, (vmem_cap * 3) // 4)

    cost = pl.CostEstimate(
        flops=4 * N * D,
        transcendentals=N,
        bytes_accessed=2 * N * D * itemsize + D * w_itemsize,
    )

    kernel = functools.partial(_rmsnorm_kernel, eps=eps)

    out = pl.pallas_call(
        kernel,
        out_shape=jax.ShapeDtypeStruct((N, D), x.dtype),
        grid_spec=pltpu.PrefetchScalarGridSpec(
            num_scalar_prefetch=0,
            grid=grid,
            in_specs=[
                pl.BlockSpec((block_rows, D), lambda i: (i, 0)),   # x row block
                pl.BlockSpec((1, D), lambda i: (0, 0)),            # weight row
            ],
            out_specs=pl.BlockSpec((block_rows, D), lambda i: (i, 0)),
        ),
        compiler_params=pltpu.CompilerParams(
            dimension_semantics=("parallel",),
            vmem_limit_bytes=int(vmem_limit),
        ),
        cost_estimate=cost,
    )(x2, w2)

    return out.reshape(orig_shape)


def rmsnorm_reference(x, weight, eps: float = 1e-6):
    """Pure-JAX reference mirroring torch.nn.functional.rms_norm."""
    xf = x.astype(jnp.float32)
    ms = jnp.mean(xf * xf, axis=-1, keepdims=True)
    y = xf * lax.rsqrt(ms + eps) * weight.astype(jnp.float32)
    return y.astype(x.dtype)


if __name__ == "__main__":
    # Small config consistent with RMSNormLayer(dim=D): x is (batch, seq, dim).
    # D is a multiple of 128 and batch*seq a multiple of 8 so the blocks are
    # lane/sublane-dense (grid of 4 row-blocks of 64 rows each).
    B, S, D = 2, 128, 256
    eps = 1e-6

    key = jax.random.PRNGKey(0)
    kx, kw = jax.random.split(key, 2)

    x = jax.random.normal(kx, (B, S, D), dtype=jnp.float32)
    # nn.Parameter(torch.ones(dim)) initialized to ones; perturb slightly so the
    # scale actually exercises the multiply.
    weight = 1.0 + 0.1 * jax.random.normal(kw, (D,), dtype=jnp.float32)

    out = rmsnorm_forward(x, weight, eps=eps)
    out = jax.block_until_ready(out)

    ref = rmsnorm_reference(x, weight, eps=eps)
    assert out.shape == x.shape
    assert out.dtype == x.dtype
    assert jnp.allclose(out, ref, atol=1e-5, rtol=1e-5), "mismatch vs reference"

    print("KERNEL_OK")
</pallas_src>

<mosaic_0001>
module attributes {stable_mosaic.version = 11 : i64} {
  func.func @_rmsnorm_kernel(%arg0: i32, %arg1: memref<64x256xf32, #tpu.memory_space<vmem>>, %arg2: memref<1x256xf32, #tpu.memory_space<vmem>>, %arg3: memref<64x256xf32, #tpu.memory_space<vmem>>) attributes {dimension_semantics = [#tpu.dimension_semantics<parallel>], iteration_bounds = array<i64: 4>, scalar_prefetch = 0 : i64, scratch_operands = 0 : i64, tpu.core_type = #tpu.core_type<tc>, window_params = [{transform_indices = @transform_0, window_bounds = array<i64: 64, 256>}, {pipeline_mode = #tpu.pipeline_mode<synchronous>, transform_indices = @transform_1, window_bounds = array<i64: 1, 256>}, {transform_indices = @transform_2, window_bounds = array<i64: 64, 256>}]} {
    %c0 = arith.constant 0 : index
    %c0_0 = arith.constant 0 : index
    %0 = vector.load %arg1[%c0, %c0_0] : memref<64x256xf32, #tpu.memory_space<vmem>>, vector<64x256xf32>
    %1 = arith.mulf %0, %0 : vector<64x256xf32>
    %cst = arith.constant dense<0.000000e+00> : vector<64xf32>
    %2 = vector.multi_reduction <add>, %1, %cst [1] : vector<64x256xf32> to vector<64xf32>
    %3 = vector.shape_cast %2 : vector<64xf32> to vector<64x1xf32>
    %cst_1 = arith.constant 2.560000e+02 : f32
    %4 = vector.broadcast %cst_1 : f32 to vector<64x1xf32>
    %5 = arith.divf %3, %4 : vector<64x1xf32>
    %cst_2 = arith.constant 9.99999997E-7 : f32
    %6 = vector.broadcast %cst_2 : f32 to vector<64x1xf32>
    %7 = arith.addf %5, %6 : vector<64x1xf32>
    %8 = math.rsqrt %7 : vector<64x1xf32>
    %c0_3 = arith.constant 0 : index
    %c0_4 = arith.constant 0 : index
    %9 = vector.load %arg2[%c0_3, %c0_4] : memref<1x256xf32, #tpu.memory_space<vmem>>, vector<1x256xf32>
    %10 = vector.broadcast %8 : vector<64x1xf32> to vector<64x256xf32>
    %11 = arith.mulf %0, %10 : vector<64x256xf32>
    %12 = vector.broadcast %9 : vector<1x256xf32> to vector<64x256xf32>
    %13 = arith.mulf %11, %12 : vector<64x256xf32>
    %c0_5 = arith.constant 0 : index
    %c0_6 = arith.constant 0 : index
    %14 = vector.load %arg3[%c0_5, %c0_6] : memref<64x256xf32, #tpu.memory_space<vmem>>, vector<64x256xf32>
    tpu.vector_store %arg3[%c0_5, %c0_6], %13 {strides = array<i32>} : memref<64x256xf32, #tpu.memory_space<vmem>>, vector<64x256xf32>,
    return
  }
  func.func @transform_0(%arg0: i32) -> (i32, i32) {
    %c0_i32 = arith.constant 0 : i32
    %c0_i32_0 = arith.constant 0 : i32
    return %arg0, %c0_i32 : i32, i32
  }
  func.func @transform_1(%arg0: i32) -> (i32, i32) {
    %c0_i32 = arith.constant 0 : i32
    %c0_i32_0 = arith.constant 0 : i32
    %c0_i32_1 = arith.constant 0 : i32
    return %c0_i32, %c0_i32_0 : i32, i32
  }
  func.func @transform_2(%arg0: i32) -> (i32, i32) {
    %c0_i32 = arith.constant 0 : i32
    %c0_i32_0 = arith.constant 0 : i32
    return %arg0, %c0_i32 : i32, i32
  }
}

</mosaic_0001>

<bundles_post_ra>
// kernel: tpu_custom_call.1
= control target key start
LH: loop header
LB: loop body
LE: loop exit
PB: predicated region body
PF: predicated region fallthrough
CT: control target
= control target key end

     0   :  { %7 = vsyncpa [#allocation3], 0  ;;  %s1073_s0 = inlined_call_operand.hbm [shape: f32[256,256], index: 0, kind: input, shape index: {}]   ;;  %s1074_s1 = inlined_call_operand.hbm [shape: f32[1,256], index: 1, kind: input, shape index: {}]   ;;  %s1075_s2 = inlined_call_operand.hbm [shape: f32[256,256], index: 2, kind: output, shape index: {}]  }
   0x1   :  { %9 = vsyncpa [#allocation3 + $0x1], 0 }
   0x2   :  { %10 = vsyncpa [#allocation6], 0 }
   0x3   :  { %11 = vsyncpa [#allocation4], 0 }
   0x4   :  { %13 = vsyncpa [#allocation4 + $0x1], 0  ;;  %s750_s9 = smov 0   ;;  %s752_s10 = smov 0  }
   0x5   :  { %s754_s11 = smov 0   ;;  %s756_s12 = smov 0  }
   0x6 LB: > { %s771_s13 = sadd.s32 4294967295, %s727_s12   ;;  %s495_s14 = sadd.s32 4294967294, %s727_s12   ;;  %s727_s12 = sphi %s756_s12, %s1085_s12   ;;  %s723_s11 = sphi %s754_s11, %s1084_s11   ;;  %s719_s10 = sphi %s752_s10, %s1083_s10   ;;  %s715_s9 = sphi %s750_s9, %s1082_s9  }
   0x7   : > { %s775_s15 = sadd.s32 1, %s727_s12   ;;  %s26_s16 = sadd.s32 1, %s723_s11 }
   0x8   : > { %s23_s17 = ssub.s32 %s727_s12, %s775_s15  ;;  %p33_p0 = scmp.ne.s32.totalorder %s723_s11, %s719_s10 }
   0x9   : > { %p24_p1 = scmp.eq.s32.totalorder %s23_s17, 0  ;;  %p34_p2 = scmp.eq.s32.totalorder %s727_s12, 0 }
   0xa   : > { %p39_p3 = scmp.ne.s32.totalorder %s719_s10, %s715_s9  ;;  %p40_p4 = scmp.eq.s32.totalorder %s771_s13, 0 }
   0xb   : > { %s787_s18 = scalar_select %p24_p1, %s723_s11, %s26_s16  }
   0xc   : > { %p789_p5 = por %p34_p2, %p33_p0  ;;  %p795_p6 = por %p40_p4, %p39_p3 }
   0xd   : > { %p84_p7 = scmp.eq.s32.totalorder %s771_s13, 3  ;;  %p90_p8 = scmp.eq.s32.totalorder %s495_s14, 3 }
   0xe   : > { %p496_p9 = scmp.ge.s32.totalorder %s727_s12, 1  ;;  %p97_p10 = scmp.lt.s32.totalorder %s727_s12, 5 }
   0xf   : > { %p802_p11 = por %p84_p7, %p33_p0  ;;  %p806_p12 = por %p90_p8, %p39_p3 }
  0x10   : > { %p810_p13 = pnand %p496_p9, %p97_p10  ;;  %s109_s26 = sshll.u32 %s1074_s1, 4  ;;  %s110_s26 = int_to_ptr.hbm [resolvable:$true] %s109_s26 }
  0x11   : > { %s729_s27 = smov [#allocation5]   ;;  %p538_p2 = scmp.lt.s32.totalorder %s727_s12, 4 }
  0x12   : > { %p525_p1 = pneg %p810_p13  ;;  %s111_s28 = sshll.u32 %s729_s27, 4  ;;  %s112_s28 = int_to_ptr.vmem [resolvable:$true] %s111_s28 }
  0x13   : > { %s122_s29 = sand.u32 1, %s723_s11   ;;  %p825_p3 = pnand %p538_p2, %p789_p5 }
  0x14   : > { %p526_p0 = pnand %p525_p1, %p40_p4  ;;  %s499_s3 = sshll.u32 %s122_s29, 7 }
  0x15   : > { %s514_s4 = sshll.u32 %s727_s12, 7  ;;  %s126_s14 = scalar_lea.vmem [#allocation2], %s499_s3 }
  0x16   : > { %528 = dma.hbm_to_vmem [thread:$0]  (!%p526_p0), %s110_s26, 32, %s112_s28, [#allocation6]  }
  0x17   : > { %s132_s7 = scalar_lea.hbm %s1073_s0, %s514_s4  ;;  %s135_s16 = sshll.u32 %s126_s14, 4  ;;  %s136_s16 = int_to_ptr.vmem [resolvable:$true] %s135_s16 }
  0x18   : > { %s133_s8 = sshll.u32 %s132_s7, 4  ;;  %s123_s17 = scalar_lea.sflag [#allocation3], %s122_s29  ;;  %s134_s8 = int_to_ptr.hbm [resolvable:$true] %s133_s8 }
  0x19   : > { %s627_s24 = sshra.s32 %s134_s8, 4  ;;  %p631_p7 = pneg %p825_p3  ;;  %s628_s24 = int_to_ptr.hbm [resolvable:$true] %s627_s24 }
  0x1a   : > { %s629_s19 = scalar_lea.hbm %s628_s24, 128  ;;  %s634_s27 = scalar_lea.hbm %s1073_s0, 512 }
  0x1b   : > { %p630_p5 = scmp.ne.s32.totalorder %s628_s24, %s629_s19  ;;  %p635_p10 = scmp.lt.s32.totalorder %s628_s24, %s1073_s0 }
  0x1c   : > { %p636_p1 = scmp.lt.s32.totalorder %s634_s27, %s629_s19 }
  0x1d   : > { %p632_p8 = pnand %p631_p7, %p630_p5 }
  0x1e   : > { %p637_p0 = por %p636_p1, %p635_p10 }
  0x1f   : > { %p633_p9 = pneg %p632_p8 }
  0x21   : > { %p638_p2 = pnand %p637_p0, %p633_p9 }
  0x23   : > { %641 = shalt.err (!%p638_p2)
}
  0x24   : > { %s730_s29 = smov 256   ;;  %s731_s3 = smov 16  }
  0x25   : > { %532 = dma.hbm_to_vmem [thread:$0]  (!%p825_p3), %s134_s8, 2048, %s136_s16, %s123_s17, %s730_s29, %s730_s29, %s731_s3  }
  0x26   : > { %147 = sbr.rel (%p810_p13) target bundleno = 223 (0xdf), region = 28  ;;  %s846_s5 = sand.u32 (!%p810_p13), 1, %s719_s10  }
  0x27   : > { %s504_s6 = sshll.u32 (!%p810_p13), %s846_s5, 7  ;;  %s150_s7 = scalar_lea.sflag (!%p810_p13), [#allocation3], %s846_s5 }
  0x28   : > { %s852_s14 = scalar_lea.vmem (!%p810_p13), [#allocation2], %s504_s6 }
  0x2b   : > { %702 = dma.done.wait (%p795_p6), %s150_s7, 2048  }
  0x2c   : > { %704 = vsyncadd (%p795_p6), %s150_s7, 4294965248 }
  0x2d   : > { %706 = dma.done.wait (%p40_p4), [#allocation6], 32  }
  0x2e   : > { %708 = vsyncadd (%p40_p4), [#allocation6], 4294967264  ;;  %v863_v0 = vld [vmem:[%s852_s14 + $0x40] sm:$0xff]  ;;  %v866_v1 = vld [vmem:[%s852_s14 + $0x48] sm:$0xff]  ;;  %v732_v40 = vmov 256.0   ;;  %s987_s20 = scalar_lea.vmem [#allocation7], %s504_s6 }
  0x2f   : > { %v869_v2 = vld [vmem:[%s852_s14 + $0x20] sm:$0xff]  ;;  %v206_v3 = vmul.f32 %v863_v0, %v863_v0  ;;  %v207_v4 = vmul.f32 %v866_v1, %v866_v1  ;;  %v876_v5 = vld [vmem:[%s852_s14 + $0x28] sm:$0xff]  ;;  %v893_v12 = vld [vmem:[%s852_s14 + $0x50] sm:$0xff]  ;;  %579 = vrcp.f32 %v732_v40  ;;  %s516_s23 = sshll.u32 %s771_s13, 7  ;;  %s409_s13 = sshll.u32 %s987_s20, 4  ;;  %s410_s13 = int_to_ptr.vmem [resolvable:$true] %s409_s13 }
  0x30   : > { %v202_v6 = vmul.f32 %v869_v2, %v869_v2  ;;  %v881_v7 = vld [vmem:[%s852_s14] sm:$0xff]  ;;  %v884_v8 = vld [vmem:[%s852_s14 + $0x8] sm:$0xff]  ;;  %v203_v9 = vmul.f32 %v876_v5, %v876_v5  ;;  %v896_v13 = vld [vmem:[%s852_s14 + $0x58] sm:$0xff]  ;;  %v208_v21 = vmul.f32 %v893_v12, %v893_v12  ;;  %s408_s16 = scalar_lea.hbm %s1075_s2, %s516_s23  ;;  %s396_s24 = scalar_lea.sflag [#allocation4], %s846_s5 }
  0x31   : > { %v198_v10 = vmul.f32 %v881_v7, %v881_v7  ;;  %v199_v11 = vmul.f32 %v884_v8, %v884_v8  ;;  %v899_v14 = vld [vmem:[%s852_s14 + $0x30] sm:$0xff]  ;;  %v226_v15 = vadd.f32 %v207_v4, %v206_v3  ;;  %v902_v16 = vld [vmem:[%s852_s14 + $0x38] sm:$0xff]  ;;  %v209_v22 = vmul.f32 %v896_v13, %v896_v13  ;;  %v929_v32 = vld [vmem:[%s852_s14 + $0x60] sm:$0xff]  ;;  %s411_s17 = sshll.u32 %s408_s16, 4  ;;  %s677_s28 = scalar_lea.hbm %s1075_s2, 512  ;;  %s412_s17 = int_to_ptr.hbm [resolvable:$true] %s411_s17 }
  0x32   : > { %v905_v17 = vld [vmem:[%s852_s14 + $0x10] sm:$0xff]  ;;  %v908_v18 = vld [vmem:[%s852_s14 + $0x18] sm:$0xff]  ;;  %v220_v19 = vadd.f32 %v203_v9, %v202_v6  ;;  %v204_v23 = vmul.f32 %v899_v14, %v899_v14  ;;  %v205_v24 = vmul.f32 %v902_v16, %v902_v16  ;;  %v932_v33 = vld [vmem:[%s852_s14 + $0x68] sm:$0xff]  ;;  %v210_v36 = vmul.f32 %v929_v32, %v929_v32  ;;  %s671_s19 = sshra.s32 %s412_s17, 4  ;;  %s672_s19 = int_to_ptr.hbm [resolvable:$true] %s671_s19 }
  0x33   : > { %v214_v20 = vadd.f32 %v199_v11, %v198_v10  ;;  %227 = vadd.xlane.f32.xlu2 %v226_v15  ;;  %v200_v25 = vmul.f32 %v905_v17, %v905_v17  ;;  %v201_v26 = vmul.f32 %v908_v18, %v908_v18  ;;  %v229_v27 = vadd.f32 %v209_v22, %v208_v21  ;;  %v923_v30 = vld [vmem:[%s852_s14 + $0x70] sm:$0xff]  ;;  %v926_v31 = vld [vmem:[%s852_s14 + $0x78] sm:$0xff]  ;;  %v341_v11 = vld [vmem:[#allocation5] sm:$0x3]  ;;  %s673_s25 = scalar_lea.hbm %s672_s19, 128  ;;  %p678_p3 = scmp.lt.s32.totalorder %s672_s19, %s1075_s2 }
  0x34   : > { %221 = vadd.xlane.f32.xlu1 %v220_v19  ;;  %v223_v28 = vadd.f32 %v205_v24, %v204_v23  ;;  %v212_v34 = vmul.f32 %v923_v30, %v923_v30  ;;  %v213_v35 = vmul.f32 %v926_v31, %v926_v31  ;;  %v211_v37 = vmul.f32 %v932_v33, %v932_v33  ;;  %p674_p4 = scmp.ne.s32.totalorder %s672_s19, %s673_s25  ;;  %p679_p5 = scmp.lt.s32.totalorder %s677_s28, %s673_s25 }
  0x35   : > { %215 = vadd.xlane.f32.xlu0 %v214_v20  ;;  %v217_v29 = vadd.f32 %v201_v26, %v200_v25  ;;  %v580_v41 = vpop.eup %579  ;;  %v955_v22 = vperm.slane %v341_v11, 0  ;;  %v957_v23 = vperm.slane %v341_v11, 1 }
  0x36   : > { %v235_v38 = vadd.f32 %v213_v35, %v212_v34  ;;  %v232_v39 = vadd.f32 %v211_v37, %v210_v36  ;;  %v239_v42 = vmul.f32 256.0, %v580_v41  ;;  %vm243_vm0 = vweird.f32 %v580_v41  ;;  %p675_p6 = pnand %p674_p4, %p802_p11  ;;  %p680_p7 = por %p679_p5, %p678_p3 }
  0x38   : > { %v240_v43 = vsub.f32 1.0, %v239_v42  ;;  %p676_p13 = pneg %p675_p6 }
  0x3a   : > { %v241_v44 = vmul.f32 %v580_v41, %v240_v43  ;;  %p681_p8 = pnand %p680_p7, %p676_p13 }
  0x3b   : > { %230 = vadd.xlane.f32.xlu2 %v229_v27 }
  0x3c   : > { %224 = vadd.xlane.f32.xlu1 %v223_v28  ;;  %v242_v45 = vadd.f32 %v580_v41, %v241_v44 }
  0x3d   : > { %218 = vadd.xlane.f32.xlu0 %v217_v29 }
  0x3e   : > { %v244_v46 = vsel %vm243_vm0, %v580_v41, %v242_v45 }
  0x44   : > { %236 = vadd.xlane.f32.xlu1 %v235_v38 }
  0x45   : > { %233 = vadd.xlane.f32.xlu0 %v232_v39 }
  0xa6   : > { %v228_v47 = vpop.xlane.xlu2 %227 }
  0xa7   : > { %v249_v48 = vmul.f32 %v244_v46, %v228_v47  ;;  %v222_v49 = vpop.xlane.xlu1 %221 }
  0xa8   : > { %v216_v50 = vpop.xlane.xlu0 %215  ;;  %v247_v51 = vmul.f32 %v244_v46, %v222_v49 }
  0xa9   : > { %v245_v52 = vmul.f32 %v244_v46, %v216_v50  ;;  %v257_v53 = vadd.f32 1e-06, %v249_v48 }
  0xaa   : > { %v255_v54 = vadd.f32 1e-06, %v247_v51 }
  0xab   : > { %v942_v55 = vadd.f32 1e-06, %v245_v52  ;;  %581 = vrsqrt.f32 %v257_v53  ;;  %vm307_vm1 = vweird.f32 %v257_v53 }
  0xac   : > { %583 = vrsqrt.f32 %v255_v54  ;;  %vm287_vm2 = vweird.f32 %v255_v54 }
  0xad   : > { %585 = vrsqrt.f32 %v942_v55  ;;  %vm267_vm3 = vweird.f32 %v942_v55 }
  0xae   : > { %v231_v56 = vpop.xlane.xlu2 %230 }
  0xaf   : > { %v250_v57 = vmul.f32 %v244_v46, %v231_v56  ;;  %v225_v58 = vpop.xlane.xlu1 %224 }
  0xb0   : > { %v219_v59 = vpop.xlane.xlu0 %218  ;;  %v248_v60 = vmul.f32 %v244_v46, %v225_v58 }
  0xb1   : > { %v246_v61 = vmul.f32 %v244_v46, %v219_v59  ;;  %v582_v62 = vpop.eup %581  ;;  %v945_v63 = vadd.f32 1e-06, %v250_v57 }
  0xb2   : > { %v584_v3 = vpop.eup %583  ;;  %v302_v4 = vmul.f32 %v582_v62, %v257_v53  ;;  %v947_v6 = vadd.f32 1e-06, %v248_v60  ;;  %vm308_vm4 = vweird.f32 %v582_v62 }
  0xb3   : > { %v949_v9 = vadd.f32 1e-06, %v246_v61  ;;  %v586_v10 = vpop.eup %585  ;;  %v282_v15 = vmul.f32 %v584_v3, %v255_v54  ;;  %587 = vrsqrt.f32 %v945_v63  ;;  %vm288_vm5 = vweird.f32 %v584_v3  ;;  %vm309_vm8 = vmor %vm307_vm1, %vm308_vm4 }
  0xb4   : > { %v303_v19 = vmul.f32 %v582_v62, %v302_v4  ;;  %v262_v20 = vmul.f32 %v586_v10, %v942_v55  ;;  %589 = vrsqrt.f32 %v947_v6  ;;  %vm268_vm6 = vweird.f32 %v586_v10  ;;  %vm289_vm10 = vmor %vm287_vm2, %vm288_vm5 }
  0xb5   : > { %v283_v21 = vmul.f32 %v584_v3, %v282_v15  ;;  %591 = vrsqrt.f32 %v949_v9  ;;  %vm317_vm7 = vweird.f32 %v945_v63  ;;  %vm269_vm11 = vmor %vm267_vm3, %vm268_vm6  ;;  %vm297_vm14 = vweird.f32 %v947_v6 }
  0xb6   : > { %v304_v24 = vmul.f32 0.5, %v303_v19  ;;  %v263_v25 = vmul.f32 %v586_v10, %v262_v20  ;;  %vm277_vm1 = vweird.f32 %v949_v9 }
  0xb7   : > { %v284_v26 = vmul.f32 0.5, %v283_v21  ;;  %v237_v27 = vpop.xlane.xlu1 %236 }
  0xb8   : > { %v234_v28 = vpop.xlane.xlu0 %233  ;;  %v305_v29 = vsub.f32 1.5, %v304_v24  ;;  %v264_v34 = vmul.f32 0.5, %v263_v25  ;;  %v252_v35 = vmul.f32 %v244_v46, %v237_v27 }
  0xb9   : > { %v588_v36 = vpop.eup %587  ;;  %v285_v37 = vsub.f32 1.5, %v284_v26  ;;  %v251_v42 = vmul.f32 %v244_v46, %v234_v28 }
  0xba   : > { %v590_v38 = vpop.eup %589  ;;  %v306_v39 = vmul.f32 %v582_v62, %v305_v29  ;;  %v265_v40 = vsub.f32 1.5, %v264_v34  ;;  %v312_v41 = vmul.f32 %v588_v36, %v945_v63  ;;  %vm318_vm9 = vweird.f32 %v588_v36 }
  0xbb   : > { %v962_v43 = vpop.eup %591  ;;  %v286_v44 = vmul.f32 %v584_v3, %v285_v37  ;;  %v292_v45 = vmul.f32 %v590_v38, %v947_v6  ;;  %v966_v47 = vadd.f32 1e-06, %v252_v35  ;;  %vm298_vm12 = vweird.f32 %v590_v38  ;;  %vm319_vm13 = vmor %vm317_vm7, %vm318_vm9 }
  0xbc   : > { %v310_v48 = vsel %vm309_vm8, %v582_v62, %v306_v39  ;;  %v266_v49 = vmul.f32 %v586_v10, %v265_v40  ;;  %v313_v50 = vmul.f32 %v588_v36, %v312_v41  ;;  %v272_v51 = vmul.f32 %v962_v43, %v949_v9  ;;  %vm299_vm15 = vmor %vm297_vm14, %vm298_vm12 }
  0xbd   : > { %v350_v46 = vmul.f32 %v310_v48, %v863_v0  ;;  %v351_v52 = vmul.f32 %v310_v48, %v866_v1  ;;  %v290_v53 = vsel %vm289_vm10, %v584_v3, %v286_v44  ;;  %v293_v56 = vmul.f32 %v590_v38, %v292_v45 }
  0xbe   : > { %v346_v57 = vmul.f32 %v290_v53, %v869_v2  ;;  %v347_v54 = vmul.f32 %v290_v53, %v876_v5  ;;  %v270_v58 = vsel %vm269_vm11, %v586_v10, %v266_v49  ;;  %v314_v59 = vmul.f32 0.5, %v313_v50 }
  0xbf   : > { %v371_v60 = vmul.f32 %v955_v22, %v350_v46  ;;  %v372_v61 = vmul.f32 %v957_v23, %v351_v52  ;;  %v342_v0 = vmul.f32 %v270_v58, %v881_v7  ;;  %v343_v1 = vmul.f32 %v270_v58, %v884_v8 }
  0xc0   : > { %v367_v62 = vmul.f32 %v955_v22, %v346_v57  ;;  %v368_v55 = vmul.f32 %v957_v23, %v347_v54  ;;  %v315_v3 = vsub.f32 1.5, %v314_v59  ;;  %v294_v4 = vmul.f32 0.5, %v293_v56 }
  0xc1   : > { %387 = vst [vmem:[%s987_s20 + $0x40] sm:$0xff] %v371_v60  ;;  %v363_v2 = vmul.f32 %v955_v22, %v342_v0  ;;  %v273_v5 = vmul.f32 %v962_v43, %v272_v51  ;;  %v364_v7 = vmul.f32 %v957_v23, %v343_v1  ;;  %593 = vrsqrt.f32 %v966_v47 }
  0xc2   : > { %388 = vst [vmem:[%s987_s20 + $0x48] sm:$0xff] %v372_v61  ;;  %v316_v8 = vmul.f32 %v588_v36, %v315_v3  ;;  %v295_v10 = vsub.f32 1.5, %v294_v4  ;;  %v259_v15 = vadd.f32 1e-06, %v251_v42  ;;  %vm278_vm0 = vweird.f32 %v962_v43 }
  0xc3   : > { %383 = vst [vmem:[%s987_s20 + $0x20] sm:$0xff] %v367_v62  ;;  %v274_v11 = vmul.f32 0.5, %v273_v5  ;;  %vm279_vm2 = vmor %vm277_vm1, %vm278_vm0  ;;  %vm337_vm4 = vweird.f32 %v966_v47 }
  0xc4   : > { %384 = vst [vmem:[%s987_s20 + $0x28] sm:$0xff] %v368_v55  ;;  %v320_v19 = vsel %vm319_vm13, %v588_v36, %v316_v8  ;;  %v296_v20 = vmul.f32 %v590_v38, %v295_v10  ;;  %595 = vrsqrt.f32 %v259_v15  ;;  %vm327_vm7 = vweird.f32 %v259_v15 }
  0xc5   : > { %379 = vst [vmem:[%s987_s20] sm:$0xff] %v363_v2  ;;  %v352_v21 = vmul.f32 %v320_v19, %v893_v12  ;;  %v353_v24 = vmul.f32 %v320_v19, %v896_v13  ;;  %v275_v25 = vsub.f32 1.5, %v274_v11 }
  0xc6   : > { %380 = vst [vmem:[%s987_s20 + $0x8] sm:$0xff] %v364_v7  ;;  %v300_v63 = vsel %vm299_vm15, %v590_v38, %v296_v20 }
  0xc7   : > { %v373_v26 = vmul.f32 %v955_v22, %v352_v21  ;;  %v374_v6 = vmul.f32 %v957_v23, %v353_v24  ;;  %v348_v27 = vmul.f32 %v300_v63, %v899_v14  ;;  %v349_v12 = vmul.f32 %v300_v63, %v902_v16  ;;  %v594_v13 = vpop.eup %593 }
  0xc8   : > { %v276_v28 = vmul.f32 %v962_v43, %v275_v25  ;;  %v332_v35 = vmul.f32 %v594_v13, %v966_v47  ;;  %vm338_vm3 = vweird.f32 %v594_v13 }
  0xc9   : > { %389 = vst [vmem:[%s987_s20 + $0x50] sm:$0xff] %v373_v26  ;;  %v369_v29 = vmul.f32 %v955_v22, %v348_v27  ;;  %v370_v34 = vmul.f32 %v957_v23, %v349_v12  ;;  %vm339_vm5 = vmor %vm337_vm4, %vm338_vm3 }
  0xca   : > { %390 = vst [vmem:[%s987_s20 + $0x58] sm:$0xff] %v374_v6  ;;  %v280_v14 = vsel %vm279_vm2, %v962_v43, %v276_v28  ;;  %v596_v16 = vpop.eup %595  ;;  %v333_v37 = vmul.f32 %v594_v13, %v332_v35 }
  0xcb   : > { %385 = vst [vmem:[%s987_s20 + $0x30] sm:$0xff] %v369_v29  ;;  %v344_v36 = vmul.f32 %v280_v14, %v905_v17  ;;  %v345_v9 = vmul.f32 %v280_v14, %v908_v18  ;;  %v322_v38 = vmul.f32 %v596_v16, %v259_v15  ;;  %vm328_vm6 = vweird.f32 %v596_v16 }
  0xcc   : > { %386 = vst [vmem:[%s987_s20 + $0x38] sm:$0xff] %v370_v34  ;;  %v334_v41 = vmul.f32 0.5, %v333_v37  ;;  %vm329_vm8 = vmor %vm327_vm7, %vm328_vm6 }
  0xcd   : > { %v365_v39 = vmul.f32 %v955_v22, %v344_v36  ;;  %v366_v40 = vmul.f32 %v957_v23, %v345_v9  ;;  %v323_v42 = vmul.f32 %v596_v16, %v322_v38 }
  0xce   : > { %v335_v44 = vsub.f32 1.5, %v334_v41 }
  0xcf   : > { %381 = vst [vmem:[%s987_s20 + $0x10] sm:$0xff] %v365_v39  ;;  %v324_v43 = vmul.f32 0.5, %v323_v42 }
  0xd0   : > { %382 = vst [vmem:[%s987_s20 + $0x18] sm:$0xff] %v366_v40  ;;  %v336_v45 = vmul.f32 %v594_v13, %v335_v44 }
  0xd1   : > { %v325_v17 = vsub.f32 1.5, %v324_v43 }
  0xd2   : > { %v340_v18 = vsel %vm339_vm5, %v594_v13, %v336_v45 }
  0xd3   : > { %v356_v48 = vmul.f32 %v340_v18, %v923_v30  ;;  %v357_v49 = vmul.f32 %v340_v18, %v926_v31  ;;  %v326_v50 = vmul.f32 %v596_v16, %v325_v17 }
  0xd5   : > { %v377_v47 = vmul.f32 %v955_v22, %v356_v48  ;;  %v378_v51 = vmul.f32 %v957_v23, %v357_v49  ;;  %v330_v46 = vsel %vm329_vm8, %v596_v16, %v326_v50 }
  0xd6   : > { %v354_v52 = vmul.f32 %v330_v46, %v929_v32  ;;  %v355_v30 = vmul.f32 %v330_v46, %v932_v33 }
  0xd7   : > { %393 = vst [vmem:[%s987_s20 + $0x70] sm:$0xff] %v377_v47 }
  0xd8   : > { %394 = vst [vmem:[%s987_s20 + $0x78] sm:$0xff] %v378_v51  ;;  %v375_v31 = vmul.f32 %v955_v22, %v354_v52  ;;  %v376_v53 = vmul.f32 %v957_v23, %v355_v30 }
  0xda   : > { %391 = vst [vmem:[%s987_s20 + $0x60] sm:$0xff] %v375_v31 }
  0xdb   : > { %392 = vst [vmem:[%s987_s20 + $0x68] sm:$0xff] %v376_v53 }
  0xdc   : > { %684 = shalt.err (!%p681_p8)
}
  0xdd   : > { %s733_s3 = smov 256   ;;  %s734_s5 = smov 16  }
  0xde   : > { %523 = dma.vmem_to_hbm [thread:$0]  (%p802_p11), %s410_s13, 2048, %s412_s17, %s396_s24, %s733_s3, %s733_s3, %s734_s5  }
  0xdf PF: > { %p540_p9 = scmp.ge.s32.totalorder %s727_s12, 2  ;;  %s426_s6 = sand.u32 1, %s715_s9  }
  0xe0   : > { %s427_s7 = scalar_lea.sflag [#allocation4], %s426_s6 }
  0xe1   : > { %p534_p10 = pnand %p540_p9, %p806_p12 }
  0xe3   : > { %p535_p1 = pneg %p534_p10 }
  0xe5   : > { %710 = dma.done.wait (%p535_p1), %s427_s7, 2048  }
  0xe6   : > { %712 = vsyncadd (%p535_p1), %s427_s7, 4294965248  ;;  %p16_p0 = scmp.ge.s32.totalorder %s775_s15, 6   ;;  %s1082_s9 = smov %s719_s10 }
  0xe7   : > { %s1083_s10 = smov %s723_s11  ;;  %s1084_s11 = smov %s787_s18 }
  0xe8   : > { %s1085_s12 = smov %s775_s15  ;;  %18 = sbr.rel (!%p16_p0) target bundleno = 6 (0x6), region = 77 }
  0xed   :  { %433 = vsyncpa [#allocation3], 1 }
  0xee   :  { %435 = vsyncpa [#allocation3 + $0x1], 1 }
  0xef   :  { %436 = vsyncpa [#allocation6], 1 }
  0xf0   :  { %437 = vsyncpa [#allocation4], 1 }
  0xf1   :  { %439 = vsyncpa [#allocation4 + $0x1], 1 }

</bundles_post_ra>
